<compile_context>
chip_gen: v5e
topology: v5e:2x2
jax: 0.10.0
libtpu: 0.0.40
codegen_flags: <defaults>
</compile_context>

<pallas_src>
import jax
import jax.numpy as jnp
from jax.experimental import pallas as pl
from jax.experimental.pallas import tpu as pltpu

_HID1 = 50
_HID2 = 25
_LANE = 128
_TB_MAX = 65536        # lane (batch) tile cap: ~12.6 MiB double-buffered VMEM
_KERNEL_MIN_B = 2048   # below this, plain XLA wins on launch overhead


def _round_up(n, m):
    return ((n + m - 1) // m) * m


def _batch_tile(B):
    """Lane-axis (batch) tile: big enough to amortize per-step overhead,
    >= 2 grid steps (v7x megacore), capped for scoped VMEM on all gens."""
    if B <= _LANE:
        return B
    return min(_TB_MAX, _round_up(pl.cdiv(B, 2), _LANE))


def _fusion_mlp_kernel(x_ref, w1_ref, b1_ref, w2_ref, b2_ref, w3_ref, b3_ref,
                       out_ref):
    # x_ref : (d1+d2, TB) bf16   -- batch on the lane axis
    # w1_ref: (50, d1+d2) bf16,  b1_ref: (50, 1) f32
    # w2_ref: (25, 50)    bf16,  b2_ref: (25, 1) f32
    # w3_ref: (25, 1) f32 (folded layer-3 + head), b3_ref: (1, 1) f32
    # out_ref: (1, TB) f32       -- lane-dense store

    # Layer 1 + ReLU  (MXU, f32 accumulation)
    h = jnp.dot(w1_ref[...], x_ref[...],
                preferred_element_type=jnp.float32) + b1_ref[...]
    h = jnp.maximum(h, 0.0).astype(jnp.bfloat16)          # (50, TB)

    # Layer 2 + ReLU  (MXU, f32 accumulation)
    h = jnp.dot(w2_ref[...], h,
                preferred_element_type=jnp.float32) + b2_ref[...]
    h = jnp.maximum(h, 0.0)                                # (25, TB) f32

    # Folded (Linear(25,5) ; Linear(5,1)) head on VPU/XLU: broadcast multiply
    # + sublane reduce instead of an M=1 MXU matmul (MXU stays free).
    out_ref[...] = (jnp.sum(w3_ref[...] * h, axis=0, keepdims=True)
                    + b3_ref[...]).astype(out_ref.dtype)   # (1, TB)


def _xla_forward(x1, x2, params):
    """Plain f32 XLA dot chain -- small-batch fallback and reference."""
    fused = jnp.concatenate([x1, x2], axis=1)
    h = jnp.maximum(fused @ params["w1"] + params["b1"], 0.0)
    h = jnp.maximum(h @ params["w2"] + params["b2"], 0.0)
    h = h @ params["w3"] + params["b3"]
    return h @ params["wf"] + params["bf"]


def template_subspace_fusion_forward(x1, x2, params, *, force_kernel=False):
    """Full pred_model + final_prediction MLP in one Pallas kernel.

    x1: (B, d1) float32, x2: (B, d2) float32.
    Returns [prediction] with prediction shape (B, 1) float32.
    """
    B = x1.shape[0]
    d1, d2 = x1.shape[1], x2.shape[1]
    d = d1 + d2

    # Small-batch fallback: at B=8 the whole model is ~22 KFLOP; pallas_call
    # launch + preprocessing overhead would dominate.
    if B < _KERNEL_MIN_B and not force_kernel:
        return [_xla_forward(x1, x2, params)]

    # Single fused XLA pass: concat + bf16 cast + batch-on-lanes transpose.
    # (Kept on purpose -- see header note on why in-kernel transpose of the
    #  narrow (B,16)/(B,12) f32 blocks loses to this once lane padding is
    #  accounted for.)
    xt = jnp.concatenate([x1, x2], axis=1).T.astype(jnp.bfloat16)   # (d, B)

    tb = _batch_tile(B)
    grid = (pl.cdiv(B, tb),)

    def resident(shape):
        # Weights/biases: same block every grid step -> stay resident in VMEM.
        return pl.BlockSpec(shape, lambda i: (0, 0))

    w1t, b1c = params["w1t"], params["b1c"]
    w2t, b2c = params["w2t"], params["b2c"]
    w3fc, b3f = params["w3fc"], params["b3f"]

    cost = pl.CostEstimate(
        flops=2 * B * (d * _HID1 + _HID1 * _HID2 + _HID2),
        transcendentals=0,
        bytes_accessed=(B * (2 * d + 4)                      # xt read + out write
                        + 2 * (d * _HID1 + _HID1 * _HID2)    # bf16 weights
                        + 4 * (_HID1 + _HID2 + _HID2 + 1)),  # f32 biases + head
    )

    out = pl.pallas_call(
        _fusion_mlp_kernel,
        out_shape=jax.ShapeDtypeStruct((1, B), jnp.float32),
        grid=grid,
        in_specs=[
            pl.BlockSpec((d, tb), lambda i: (0, i)),   # activations, tiled on batch
            resident(w1t.shape), resident(b1c.shape),
            resident(w2t.shape), resident(b2c.shape),
            resident(w3fc.shape), resident(b3f.shape),
        ],
        out_specs=pl.BlockSpec((1, tb), lambda i: (0, i)),
        compiler_params=pltpu.CompilerParams(
            dimension_semantics=("parallel",),
            # Raise v5e's 16 MiB scoped default so the 64K-lane tile fits;
            # 32 MiB is within every generation's physical VMEM.
            vmem_limit_bytes=32 * 1024 * 1024,
        ),
        cost_estimate=cost,
    )(xt, w1t, b1c, w2t, b2c, w3fc, b3f)

    # (1, B) row-major == (B, 1) row-major: reshape is free.
    return [out.reshape(B, 1)]


def init_params(key, d1, d2):
    """Deterministic init mimicking nn.Linear default (uniform +-1/sqrt(fan_in)),
    pre-packed into the kernel's transposed / folded layout."""
    def linear(k, fan_in, fan_out):
        kw, kb = jax.random.split(k)
        bound = 1.0 / jnp.sqrt(fan_in)
        w = jax.random.uniform(kw, (fan_in, fan_out), jnp.float32, -bound, bound)
        b = jax.random.uniform(kb, (fan_out,), jnp.float32, -bound, bound)
        return w, b

    k1, k2, k3, k4 = jax.random.split(key, 4)
    w1, b1 = linear(k1, d1 + d2, _HID1)
    w2, b2 = linear(k2, _HID1, _HID2)
    w3, b3 = linear(k3, _HID2, 5)
    # final_prediction: regression head Linear(5, 1)
    # TODO(synk): binary/multiclass heads (sigmoid / Linear(5, C)) not modeled.
    wf, bf = linear(k4, 5, 1)

    # Exact fold of Linear(25,5) ; Linear(5,1): valid ONLY because there is no
    # nonlinearity between them. Guard: do not add an activation on layer 3.
    w3f = w3 @ wf                 # (25, 1)
    b3f = b3 @ wf + bf            # (1,)

    return {
        # kernel operands (transposed, batch-on-lanes; MXU operands bf16,
        # biases and the VPU head kept f32)
        "w1t": w1.T.astype(jnp.bfloat16),          # (50, d1+d2)
        "b1c": b1.reshape(_HID1, 1),               # (50, 1) f32
        "w2t": w2.T.astype(jnp.bfloat16),          # (25, 50)
        "b2c": b2.reshape(_HID2, 1),               # (25, 1) f32
        "w3fc": w3f,                               # (25, 1) f32
        "b3f": b3f.reshape(1, 1),                  # (1, 1) f32
        # full-precision originals for the fallback path / reference check
        "w1": w1, "b1": b1, "w2": w2, "b2": b2,
        "w3": w3, "b3": b3, "wf": wf, "bf": bf,
    }


if __name__ == "__main__":
    key = jax.random.PRNGKey(0)
    k1, k2, k3, k4, kp = jax.random.split(key, 5)

    d1, d2 = 16, 12  # data_dims = [16, 12]
    params = init_params(kp, d1, d2)

    # 1) Demo-sized batch (B=8): force the kernel path (single full-array block).
    B_small = 8
    x1s = jax.random.normal(k1, (B_small, d1), jnp.float32)
    x2s = jax.random.normal(k2, (B_small, d2), jnp.float32)
    pred_s = template_subspace_fusion_forward(x1s, x2s, params,
                                              force_kernel=True)[0]
    pred_s = jax.block_until_ready(pred_s)
    ref_s = _xla_forward(x1s, x2s, params)
    assert pred_s.shape == (B_small, 1)
    assert jnp.allclose(pred_s, ref_s, atol=3e-2, rtol=3e-2), (
        float(jnp.max(jnp.abs(pred_s - ref_s))))

    # 2) Larger batch: exercises the tiled path (2 grid steps -> both v7x TCs).
    B_big = 4096
    x1b = jax.random.normal(k3, (B_big, d1), jnp.float32)
    x2b = jax.random.normal(k4, (B_big, d2), jnp.float32)
    pred_b = template_subspace_fusion_forward(x1b, x2b, params)[0]
    pred_b = jax.block_until_ready(pred_b)
    ref_b = _xla_forward(x1b, x2b, params)
    assert pred_b.shape == (B_big, 1)
    assert jnp.allclose(pred_b, ref_b, atol=3e-2, rtol=3e-2), (
        float(jnp.max(jnp.abs(pred_b - ref_b))))

    print("KERNEL_OK")
</pallas_src>

<mosaic_0001>
module attributes {stable_mosaic.version = 11 : i64} {
  func.func @_fusion_mlp_kernel(%arg0: i32, %arg1: memref<28x8xbf16, #tpu.memory_space<vmem>>, %arg2: memref<50x28xbf16, #tpu.memory_space<vmem>>, %arg3: memref<50x1xf32, #tpu.memory_space<vmem>>, %arg4: memref<25x50xbf16, #tpu.memory_space<vmem>>, %arg5: memref<25x1xf32, #tpu.memory_space<vmem>>, %arg6: memref<25x1xf32, #tpu.memory_space<vmem>>, %arg7: memref<1x1xf32, #tpu.memory_space<vmem>>, %arg8: memref<1x8xf32, #tpu.memory_space<vmem>>) attributes {dimension_semantics = [#tpu.dimension_semantics<parallel>], iteration_bounds = array<i64: 1>, scalar_prefetch = 0 : i64, scratch_operands = 0 : i64, tpu.core_type = #tpu.core_type<tc>, window_params = [{transform_indices = @transform_0, window_bounds = array<i64: 28, 8>}, {pipeline_mode = #tpu.pipeline_mode<synchronous>, transform_indices = @transform_1, window_bounds = array<i64: 50, 28>}, {pipeline_mode = #tpu.pipeline_mode<synchronous>, transform_indices = @transform_2, window_bounds = array<i64: 50, 1>}, {pipeline_mode = #tpu.pipeline_mode<synchronous>, transform_indices = @transform_3, window_bounds = array<i64: 25, 50>}, {pipeline_mode = #tpu.pipeline_mode<synchronous>, transform_indices = @transform_4, window_bounds = array<i64: 25, 1>}, {pipeline_mode = #tpu.pipeline_mode<synchronous>, transform_indices = @transform_5, window_bounds = array<i64: 25, 1>}, {pipeline_mode = #tpu.pipeline_mode<synchronous>, transform_indices = @transform_6, window_bounds = array<i64: 1, 1>}, {transform_indices = @transform_7, window_bounds = array<i64: 1, 8>}]} {
    %c0 = arith.constant 0 : index
    %c0_0 = arith.constant 0 : index
    %0 = vector.load %arg2[%c0, %c0_0] : memref<50x28xbf16, #tpu.memory_space<vmem>>, vector<50x28xbf16>
    %c0_1 = arith.constant 0 : index
    %c0_2 = arith.constant 0 : index
    %1 = vector.load %arg1[%c0_1, %c0_2] : memref<28x8xbf16, #tpu.memory_space<vmem>>, vector<28x8xbf16>
    %cst = arith.constant dense<0.000000e+00> : vector<50x8xf32>
    %2 = tpu.matmul %0, %1, %cst {dimension_numbers = #tpu.dot_dimension_numbers<[1], [0], [0], [1], [0, 0, 1, 1], [], []>} : vector<50x28xbf16>, vector<28x8xbf16>, vector<50x8xf32> -> vector<50x8xf32>
    %c0_3 = arith.constant 0 : index
    %c0_4 = arith.constant 0 : index
    %3 = vector.load %arg3[%c0_3, %c0_4] : memref<50x1xf32, #tpu.memory_space<vmem>>, vector<50x1xf32>
    %4 = vector.broadcast %3 : vector<50x1xf32> to vector<50x8xf32>
    %5 = arith.addf %2, %4 : vector<50x8xf32>
    %cst_5 = arith.constant 0.000000e+00 : f32
    %6 = vector.broadcast %cst_5 : f32 to vector<50x8xf32>
    %7 = arith.maximumf %5, %6 : vector<50x8xf32>
    %8 = arith.truncf %7 : vector<50x8xf32> to vector<50x8xbf16>
    %c0_6 = arith.constant 0 : index
    %c0_7 = arith.constant 0 : index
    %9 = vector.load %arg4[%c0_6, %c0_7] : memref<25x50xbf16, #tpu.memory_space<vmem>>, vector<25x50xbf16>
    %cst_8 = arith.constant dense<0.000000e+00> : vector<25x8xf32>
    %10 = tpu.matmul %9, %8, %cst_8 {dimension_numbers = #tpu.dot_dimension_numbers<[1], [0], [0], [1], [0, 0, 1, 1], [], []>} : vector<25x50xbf16>, vector<50x8xbf16>, vector<25x8xf32> -> vector<25x8xf32>
    %c0_9 = arith.constant 0 : index
    %c0_10 = arith.constant 0 : index
    %11 = vector.load %arg5[%c0_9, %c0_10] : memref<25x1xf32, #tpu.memory_space<vmem>>, vector<25x1xf32>
    %12 = vector.broadcast %11 : vector<25x1xf32> to vector<25x8xf32>
    %13 = arith.addf %10, %12 : vector<25x8xf32>
    %cst_11 = arith.constant 0.000000e+00 : f32
    %14 = vector.broadcast %cst_11 : f32 to vector<25x8xf32>
    %15 = arith.maximumf %13, %14 : vector<25x8xf32>
    %c0_12 = arith.constant 0 : index
    %c0_13 = arith.constant 0 : index
    %16 = vector.load %arg6[%c0_12, %c0_13] : memref<25x1xf32, #tpu.memory_space<vmem>>, vector<25x1xf32>
    %17 = vector.broadcast %16 : vector<25x1xf32> to vector<25x8xf32>
    %18 = arith.mulf %17, %15 : vector<25x8xf32>
    %cst_14 = arith.constant dense<0.000000e+00> : vector<8xf32>
    %19 = vector.multi_reduction <add>, %18, %cst_14 [0] : vector<25x8xf32> to vector<8xf32>
    %20 = vector.shape_cast %19 : vector<8xf32> to vector<1x8xf32>
    %c0_15 = arith.constant 0 : index
    %c0_16 = arith.constant 0 : index
    %21 = vector.load %arg7[%c0_15, %c0_16] : memref<1x1xf32, #tpu.memory_space<vmem>>, vector<1x1xf32>
    %22 = vector.broadcast %21 : vector<1x1xf32> to vector<1x8xf32>
    %23 = arith.addf %20, %22 : vector<1x8xf32>
    %c0_17 = arith.constant 0 : index
    %c0_18 = arith.constant 0 : index
    %24 = vector.load %arg8[%c0_17, %c0_18] : memref<1x8xf32, #tpu.memory_space<vmem>>, vector<1x8xf32>
    tpu.vector_store %arg8[%c0_17, %c0_18], %23 {strides = array<i32>} : memref<1x8xf32, #tpu.memory_space<vmem>>, vector<1x8xf32>,
    return
  }
  func.func @transform_0(%arg0: i32) -> (i32, i32) {
    %c0_i32 = arith.constant 0 : i32
    %c0_i32_0 = arith.constant 0 : i32
    return %c0_i32, %arg0 : i32, i32
  }
  func.func @transform_1(%arg0: i32) -> (i32, i32) {
    %c0_i32 = arith.constant 0 : i32
    %c0_i32_0 = arith.constant 0 : i32
    %c0_i32_1 = arith.constant 0 : i32
    return %c0_i32, %c0_i32_0 : i32, i32
  }
  func.func @transform_2(%arg0: i32) -> (i32, i32) {
    %c0_i32 = arith.constant 0 : i32
    %c0_i32_0 = arith.constant 0 : i32
    %c0_i32_1 = arith.constant 0 : i32
    return %c0_i32, %c0_i32_0 : i32, i32
  }
  func.func @transform_3(%arg0: i32) -> (i32, i32) {
    %c0_i32 = arith.constant 0 : i32
    %c0_i32_0 = arith.constant 0 : i32
    %c0_i32_1 = arith.constant 0 : i32
    return %c0_i32, %c0_i32_0 : i32, i32
  }
  func.func @transform_4(%arg0: i32) -> (i32, i32) {
    %c0_i32 = arith.constant 0 : i32
    %c0_i32_0 = arith.constant 0 : i32
    %c0_i32_1 = arith.constant 0 : i32
    return %c0_i32, %c0_i32_0 : i32, i32
  }
  func.func @transform_5(%arg0: i32) -> (i32, i32) {
    %c0_i32 = arith.constant 0 : i32
    %c0_i32_0 = arith.constant 0 : i32
    %c0_i32_1 = arith.constant 0 : i32
    return %c0_i32, %c0_i32_0 : i32, i32
  }
  func.func @transform_6(%arg0: i32) -> (i32, i32) {
    %c0_i32 = arith.constant 0 : i32
    %c0_i32_0 = arith.constant 0 : i32
    %c0_i32_1 = arith.constant 0 : i32
    return %c0_i32, %c0_i32_0 : i32, i32
  }
  func.func @transform_7(%arg0: i32) -> (i32, i32) {
    %c0_i32 = arith.constant 0 : i32
    %c0_i32_0 = arith.constant 0 : i32
    return %c0_i32, %arg0 : i32, i32
  }
}

</mosaic_0001>

<bundles_post_ra>
// kernel: tpu_custom_call.1
= control target key start
LH: loop header
LB: loop body
LE: loop exit
PB: predicated region body
PF: predicated region fallthrough
CT: control target
= control target key end

     0   :  { %s515_s0 = inlined_call_operand.vmem [shape: bf16[28,8], index: 0, kind: input, shape index: {}]   ;;  %s516_s1 = inlined_call_operand.vmem [shape: bf16[50,28], index: 1, kind: input, shape index: {}]   ;;  %s517_s2 = inlined_call_operand.vmem [shape: f32[50,1], index: 2, kind: input, shape index: {}]   ;;  %s518_s3 = inlined_call_operand.vmem [shape: bf16[25,50], index: 3, kind: input, shape index: {}]   ;;  %s519_s4 = inlined_call_operand.vmem [shape: f32[25,1], index: 4, kind: input, shape index: {}]   ;;  %s520_s5 = inlined_call_operand.vmem [shape: f32[25,1], index: 5, kind: input, shape index: {}]   ;;  %s521_s6 = inlined_call_operand.<no memory space> [shape: f32[1,1], index: 6, kind: input, shape index: {}]   ;;  %s522_s7 = inlined_call_operand.hbm [shape: f32[1,8], index: 7, kind: output, shape index: {}]  }
   0x1   :  { %v12_v0 = vstv %s521_s6 }
   0x2   :  { %13 = vst [vmem:[#allocation2] sm:$0x1] %v12_v0 }
   0x3   :  { %v47_v1 = vld [vmem:[%s517_s2 + $0x30] sm:$0x3]  ;;  %v326_v2 = vld [vmem:[%s515_s0 + $0x8] sm:$0xf]  ;;  %v386_v3 = vmov 0   ;;  %vm125_vm0 = vcmask 1045504  }
   0x4   :  { %357 = vset.pattern.permute.xlu0 %v386_v3  ;;  %v346_v4 = vld [vmem:[%s515_s0 + $0x8] sm:$0x30]  ;;  %358 = vset.pattern.permute.xlu1 %v386_v3  ;;  %v345_v8 = vld [vmem:[%s515_s0] sm:$0xff]  ;;  %v44_v9 = vld [vmem:[%s517_s2 + $0x18] sm:$0xff] }
   0x5   :  { %80 = vperm.xlu0 %357, %v47_v1   ;;  %v327_v5 = vor.u32 %v346_v4, %v326_v2  ;;  %v46_v6 = vld [vmem:[%s517_s2 + $0x28] sm:$0xff]  ;;  %359 = vset.pattern.permute.xlu2 %v386_v3 }
   0x6   :  { %75 = vperm.xlu1 %358, %v46_v6   ;;  %65 = vperm.xlu2 %359, %v44_v9  }
   0x7   :  { %v127_v7 = vsel %vm125_vm0, %v327_v5, 0 }
   0x8   :  { %135 = vmatpush.bf16.msra.mxu0 %v127_v7  ;;  %349 = vmatpush.bf16.msra.mxu2 %v127_v7 }
   0x9   :  { %14 = vsyncpa [#allocation4], 0  ;;  %v45_v10 = vld [vmem:[%s517_s2 + $0x20] sm:$0xff]  ;;  %v344_v12 = vld [vmem:[%s516_s1 + $0x10] sm:$0xff]  ;;  %vm112_vm1 = vcmask 228352   ;;  %vm213_vm2 = vcmask 1040384  }
   0xa   :  { %v342_v11 = vld [vmem:[%s516_s1] sm:$0xff]  ;;  %v43_v13 = vld [vmem:[%s517_s2 + $0x10] sm:$0xff]  ;;  %v42_v15 = vld [vmem:[%s517_s2 + $0x8] sm:$0xff]  ;;  %vm206_vm3 = vcmask 408576   ;;  %vm268_vm4 = vcmask 64512   ;;  %vm274_vm5 = vcmask 57344  }
   0xb   :  { %v41_v14 = vld [vmem:[%s517_s2] sm:$0xff]  ;;  %v36_v17 = vld [vmem:[%s516_s1 + $0x18] sm:$0x1]  ;;  %v173_v18 = vld [vmem:[%s519_s4 + $0x8] sm:$0xff]  ;;  %s299_s25 = sshll.u32 %s522_s7, 4  ;;  %s300_s25 = int_to_ptr.hbm [resolvable:$true] %s299_s25 }
   0xc   :  { %136 = vmatpush.bf16.msra.mxu0 %v345_v8  ;;  %350 = vmatpush.bf16.msra.mxu2 %v345_v8  ;;  %v172_v16 = vld [vmem:[%s519_s4] sm:$0xff]  ;;  %v96_v19 = vunpack.c.l.b16 %v36_v17  ;;  %v174_v20 = vld [vmem:[%s519_s4 + $0x10] sm:$0xff]  ;;  %v343_v21 = vld [vmem:[%s516_s1 + $0x8] sm:$0xff] }
   0xd   :  { %70 = vperm.xlu0 %357, %v45_v10   ;;  %v175_v23 = vld [vmem:[%s519_s4 + $0x18] sm:$0x1]  ;;  %v240_v24 = vld [vmem:[%s520_s5] sm:$0xff]  ;;  %v241_v25 = vld [vmem:[%s520_s5 + $0x8] sm:$0xff] }
   0xe   :  { %60 = vperm.xlu1 %358, %v43_v13   ;;  %50 = vperm.xlu2 %359, %v41_v14   ;;  %v100_v22 = vpack.c.b16 %v96_v19, %v96_v19  ;;  %v242_v26 = vld [vmem:[%s520_s5 + $0x10] sm:$0xff]  ;;  %v243_v27 = vld [vmem:[%s520_s5 + $0x18] sm:$0x1]  ;;  %v283_v28 = vld [vmem:[#allocation2] sm:$0x1] }
   0xf   :  { %328 = vmatmul.msk.bf16.vlgmr.msra.gmra.mxu0 %vm112_vm1, %v342_v11  ;;  %330 = vmatmul.msk.bf16.vlgmr.msra.gmra.mxu2 %vm112_vm1, %v344_v12  ;;  %v338_v62 = vld [vmem:[%s518_s3 + $0x8] sm:$0xf]  ;;  %v348_v63 = vld [vmem:[%s518_s3 + $0x8] sm:$0x10]  ;;  %v347_v1 = vld [vmem:[%s518_s3] sm:$0xff]  ;;  %s387_s3 = smov [#allocation3]  }
  0x10   :  { %v339_v2 = vor.u32 %v348_v63, %v338_v62  ;;  %s297_s22 = sshll.u32 %s387_s3, 4  ;;  %s298_s22 = int_to_ptr.vmem [resolvable:$true] %s297_s22 }
  0x15   :  { %55 = vperm.xlu0 %357, %v42_v15  }
  0x16   :  { %178 = vperm.xlu1 %358, %v172_v16   ;;  %183 = vperm.xlu2 %359, %v173_v18  }
  0x1d   :  { %188 = vperm.xlu0 %357, %v174_v20  }
  0x1e   :  { %193 = vperm.xlu1 %358, %v175_v23   ;;  %246 = vperm.xlu2 %359, %v240_v24  }
  0x1f   :  { %329 = vmatmul.msk.bf16.gmra.mxu0 %vm112_vm1, %v343_v21  ;;  %331 = vmatmul.msk.bf16.gmra.mxu2 %vm112_vm1, %v100_v22 }
  0x25   :  { %251 = vperm.xlu0 %357, %v241_v25  }
  0x26   :  { %256 = vperm.xlu1 %358, %v242_v26   ;;  %261 = vperm.xlu2 %359, %v243_v27  }
  0x2d   :  { %286 = vperm.xlu0 %357, %v283_v28  }
  0x60   :  { %v66_v36 = vpop.permute.xlu2 %65 }
  0x68   :  { %v51_v50 = vpop.permute.xlu2 %50 }
  0x70   :  { %v184_v4 = vpop.permute.xlu2 %183 }
  0x77   :  { %v81_v32 = vpop.permute.xlu0 %80 }
  0x78   :  { %v76_v35 = vpop.permute.xlu1 %75  ;;  %v247_v12 = vpop.permute.xlu2 %246 }
  0x7f   :  { %v71_v37 = vpop.permute.xlu0 %70 }
  0x80   :  { %v61_v44 = vpop.permute.xlu1 %60  ;;  %v262_v28 = vpop.permute.xlu2 %261 }
  0x87   :  { %v56_v53 = vpop.permute.xlu0 %55 }
  0x88   :  { %v179_v3 = vpop.permute.xlu1 %178 }
  0x8c   :  { %v138_v29 = vpop.f32.mrf.mxu0 }
  0x8d   :  { %v139_v54 = vadd.f32 %v138_v29, %v51_v50 }
  0x8f   :  { %v157_v59 = vmax.f32 %v139_v54, 0.0  ;;  %v189_v6 = vpop.permute.xlu0 %188 }
  0x90   :  { %v194_v8 = vpop.permute.xlu1 %193 }
  0x92   :  { %v148_v30 = vpop.f32.mrf.mxu2 }
  0x93   :  { %v149_v43 = vadd.f32 %v148_v30, %v71_v37 }
  0x94   :  { %v140_v31 = vpop.f32.mrf.mxu0 }
  0x95   :  { %v161_v51 = vmax.f32 %v149_v43, 0.0  ;;  %v141_v55 = vadd.f32 %v140_v31, %v56_v53 }
  0x97   :  { %v158_v60 = vmax.f32 %v141_v55, 0.0  ;;  %v252_v18 = vpop.permute.xlu0 %251 }
  0x98   :  { %v257_v20 = vpop.permute.xlu1 %256 }
  0x99   :  { %v164_v0 = vpack.c.bf16 %v158_v60, %v157_v59 }
  0x9a   :  { %v150_v33 = vpop.f32.mrf.mxu2 }
  0x9b   :  { %v151_v40 = vadd.f32 %v150_v33, %v76_v35 }
  0x9c   :  { %v143_v34 = vpop.f32.mrf.mxu0 }
  0x9d   :  { %v162_v46 = vmax.f32 %v151_v40, 0.0  ;;  %v144_v47 = vadd.f32 %v143_v34, %v61_v44 }
  0x9f   :  { %v159_v56 = vmax.f32 %v144_v47, 0.0  ;;  %v166_v58 = vpack.c.bf16 %v162_v46, %v161_v51 }
  0xa2   :  { %v153_v38 = vpop.f32.mrf.mxu2 }
  0xa3   :  { %v154_v39 = vadd.f32 %v153_v38, %v81_v32  ;;  %v287_v38 = vpop.permute.xlu0 %286 }
  0xa4   :  { %v145_v42 = vpop.f32.mrf.mxu0  ;;  %v289_v40 = vperm.slane %v287_v38, 0 }
  0xa5   :  { %v163_v41 = vmax.f32 %v154_v39, 0.0  ;;  %v146_v48 = vadd.f32 %v145_v42, %v66_v36 }
  0xa7   :  { %v167_v45 = vpack.c.bf16 %v163_v41, %v163_v41  ;;  %v160_v57 = vmax.f32 %v146_v48, 0.0 }
  0xa9   :  { %v215_v49 = vsel %vm213_vm2, %v167_v45, 0  ;;  %v165_v61 = vpack.c.bf16 %v160_v57, %v159_v56 }
  0xaa   :  { %v155_v52 = vpop.f32.mrf.mxu2  ;;  %221 = vmatpush.bf16.msra.mxu1 %v215_v49  ;;  %351 = vmatpush.bf16.msra.mxu3 %v215_v49 }
  0xae   :  { %222 = vmatpush.bf16.msra.mxu1 %v166_v58  ;;  %352 = vmatpush.bf16.msra.mxu3 %v166_v58 }
  0xb2   :  { %223 = vmatpush.bf16.msra.mxu1 %v165_v61  ;;  %353 = vmatpush.bf16.msra.mxu3 %v165_v61 }
  0xb6   :  { %224 = vmatpush.bf16.msra.mxu1 %v164_v0  ;;  %354 = vmatpush.bf16.msra.mxu3 %v164_v0 }
  0xb9   :  { %340 = vmatmul.msk.bf16.vlgmr.msra.gmra.mxu1 %vm206_vm3, %v347_v1  ;;  %341 = vmatmul.msk.bf16.vlgmr.msra.gmra.mxu3 %vm206_vm3, %v339_v2 }
 0x136   :  { %v226_v5 = vpop.f32.mrf.mxu1 }
 0x137   :  { %v227_v7 = vadd.f32 %v226_v5, %v179_v3 }
 0x139   :  { %v236_v10 = vmax.f32 %v227_v7, 0.0 }
 0x13b   :  { %v264_v15 = vmul.f32 %v247_v12, %v236_v10 }
 0x13c   :  { %v231_v9 = vpop.f32.mrf.mxu3 }
 0x13d   :  { %v232_v11 = vadd.f32 %v231_v9, %v189_v6  ;;  %v269_v22 = vsel %vm268_vm4, %v264_v15, 0.0 }
 0x13e   :  { %v228_v13 = vpop.f32.mrf.mxu1 }
 0x13f   :  { %v229_v14 = vadd.f32 %v228_v13, %v184_v4  ;;  %v238_v16 = vmax.f32 %v232_v11, 0.0 }
 0x141   :  { %v237_v17 = vmax.f32 %v229_v14, 0.0  ;;  %v266_v23 = vmul.f32 %v257_v20, %v238_v16 }
 0x143   :  { %v265_v19 = vmul.f32 %v252_v18, %v237_v17  ;;  %v272_v29 = vsel %vm268_vm4, %v266_v23, 0.0 }
 0x144   :  { %v233_v21 = vpop.f32.mrf.mxu3 }
 0x145   :  { %v270_v24 = vsel %vm268_vm4, %v265_v19, 0.0  ;;  %v234_v25 = vadd.f32 %v233_v21, %v194_v8 }
 0x146   :  { %v271_v26 = vadd.f32 %v270_v24, %v269_v22 }
 0x147   :  { %v239_v27 = vmax.f32 %v234_v25, 0.0 }
 0x148   :  { %v273_v31 = vadd.f32 %v272_v29, %v271_v26 }
 0x149   :  { %v267_v30 = vmul.f32 %v262_v28, %v239_v27 }
 0x14b   :  { %v275_v32 = vsel %vm274_vm5, %v267_v30, 0.0 }
 0x14c   :  { %v276_v33 = vadd.f32 %v275_v32, %v273_v31 }
 0x14e   :  { %v277_v34 = vrot.slane %v276_v33, 4 }
 0x150   :  { %v278_v35 = vadd.f32 %v277_v34, %v276_v33 }
 0x152   :  { %v279_v36 = vrot.slane %v278_v35, 2 }
 0x154   :  { %v280_v37 = vadd.f32 %v279_v36, %v278_v35 }
 0x156   :  { %v281_v39 = vrot.slane %v280_v37, 1 }
 0x158   :  { %v282_v41 = vadd.f32 %v281_v39, %v280_v37 }
 0x15a   :  { %v290_v42 = vadd.f32 %v289_v40, %v282_v41 }
 0x15c   :  { %291 = vst.msk [vmem:[#allocation3] sm:$0x1] %vm274_vm5, %v290_v42 }
 0x15d   :  { %302 = dma.vmem_to_hbm [thread:$0]  %s298_s22, 16, %s300_s25, [#allocation4]  }
 0x15e   :  { %384 = dma.done.wait [#allocation4], 16  }
 0x15f   :  { %385 = vsyncadd [#allocation4], 4294967280 }
 0x160   :  { %307 = vsyncpa [#allocation4], 1 }

</bundles_post_ra>
